<compile_context>
chip_gen: v7x
topology: tpu7x:2x2x1
jax: 0.10.0
libtpu: 0.0.40
codegen_flags: <defaults>
</compile_context>

<pallas_src>
import functools

import jax
import jax.numpy as jnp
from jax.experimental import pallas as pl
from jax.experimental.pallas import tpu as pltpu

_LANES = 128        # vreg lane width (last dim)
_SUBLANES = 8       # vreg sublane count (second-to-last dim)
# ~2 MiB per block buffer; in+out double-buffered => ~4x this in VMEM.
_TARGET_BLOCK_BYTES = 2 * 1024 * 1024


def _apply_f_kernel(x_ref, o_ref, *, f):
    """Single fused kernel: o = f(x) on one VMEM-resident lane-dense tile."""
    o_ref[...] = f(x_ref[...]).astype(o_ref.dtype)


def make_pallas_identity(f, *, max_block_rows=8192):
    """Pallas equivalent of `Identity(f)`: returns forward(x) == f(x).

    `f` must be a shape-preserving elementwise JAX function (identity,
    activations, scalings, ...); it is traced inside the Pallas kernel body.
    """
    # TODO(synk): non-elementwise `f` (reductions, matmuls, reshapes, ...)
    # would need its own lowering; this wrapper only covers pointwise f.

    def forward(x):
        x = jnp.asarray(x)
        orig_shape = x.shape
        n = x.size

        # Lane-dense 2-D layout: last dim = 128 lanes.  Only pad when the
        # element count is not a multiple of 128; pad with 1s so f's like
        # log / reciprocal stay finite in the (discarded) tail.
        padded = (n % _LANES) != 0
        if padded:
            n_pad = pl.cdiv(n, _LANES) * _LANES
            xf = jnp.pad(x.reshape(-1), (0, n_pad - n), constant_values=1)
        else:
            n_pad = n
            xf = x.reshape(-1)
        rows = n_pad // _LANES
        x2 = xf.reshape(rows, _LANES)

        # Block rows: ~2 MiB per block, multiple of 8 sublanes (or equal to
        # the full row extent for tiny inputs).  Partial last block is handled
        # by the cdiv grid — `rows` is never rounded up (no extra HBM passes).
        itemsize = jnp.dtype(x.dtype).itemsize
        block_rows = _TARGET_BLOCK_BYTES // (_LANES * itemsize)
        block_rows = min(block_rows, max_block_rows, rows)
        if rows > _SUBLANES:
            block_rows = max(_SUBLANES, (block_rows // _SUBLANES) * _SUBLANES)
        grid_rows = pl.cdiv(rows, block_rows)

        # Infer output dtype and check that f is actually shape-preserving.
        out_abs = jax.eval_shape(
            f, jax.ShapeDtypeStruct((block_rows, _LANES), x.dtype))
        assert out_abs.shape == (block_rows, _LANES), (
            "Identity(f): f must be elementwise / shape-preserving; got "
            f"{out_abs.shape} for an input block of {(block_rows, _LANES)}")
        out_dtype = out_abs.dtype
        out_itemsize = jnp.dtype(out_dtype).itemsize

        out2 = pl.pallas_call(
            functools.partial(_apply_f_kernel, f=f),
            out_shape=jax.ShapeDtypeStruct((rows, _LANES), out_dtype),
            grid=(grid_rows,),
            in_specs=[pl.BlockSpec((block_rows, _LANES), lambda i: (i, 0))],
            out_specs=pl.BlockSpec((block_rows, _LANES), lambda i: (i, 0)),
            compiler_params=pltpu.CompilerParams(
                dimension_semantics=("parallel",)),  # v7x: both TCs get tiles
            cost_estimate=pl.CostEstimate(
                flops=n_pad,
                transcendentals=0,
                bytes_accessed=n_pad * (itemsize + out_itemsize)),
        )(x2)

        if padded:
            return out2.reshape(-1)[:n].reshape(orig_shape)
        return out2.reshape(orig_shape)  # fast path: metadata-only reshape

    return forward


if __name__ == "__main__":
    key = jax.random.PRNGKey(0)
    x = jax.random.normal(key, (2, 4, 16, 16), jnp.float32)

    # Canonical instantiation: Identity(lambda t: t) -> pure pass-through.
    identity_fwd = make_pallas_identity(lambda t: t)
    y = identity_fwd(x)
    jax.block_until_ready(y)
    assert y.shape == x.shape, (y.shape, x.shape)
    assert y.dtype == x.dtype, (y.dtype, x.dtype)
    assert bool(jnp.all(y == x)), "identity output differs from input"

    # Same wrapper handles any elementwise f supplied at construction time.
    tanh_fwd = make_pallas_identity(jnp.tanh)
    z = tanh_fwd(x)
    jax.block_until_ready(z)
    assert z.shape == x.shape and z.dtype == jnp.float32
    assert bool(jnp.allclose(z, jnp.tanh(x), atol=1e-6, rtol=1e-6)), \
        "f(x) output mismatch vs reference"

    # Exercise the non-128-aligned padded path (pad-with-ones + tail slice).
    xu = jax.random.normal(jax.random.PRNGKey(0), (3, 5, 7), jnp.float32)
    w = identity_fwd(xu)
    jax.block_until_ready(w)
    assert w.shape == xu.shape and bool(jnp.all(w == xu)), \
        "padded-path identity mismatch"

    print("KERNEL_OK")
</pallas_src>

<mosaic_0001>
module attributes {stable_mosaic.version = 11 : i64} {
  func.func @_apply_f_kernel(%arg0: i32, %arg1: memref<16x128xf32, #tpu.memory_space<vmem>>, %arg2: memref<16x128xf32, #tpu.memory_space<vmem>>) attributes {dimension_semantics = [#tpu.dimension_semantics<parallel>], iteration_bounds = array<i64: 1>, scalar_prefetch = 0 : i64, scratch_operands = 0 : i64, tpu.core_type = #tpu.core_type<tc>, window_params = [{transform_indices = @transform_0, window_bounds = array<i64: 16, 128>}, {transform_indices = @transform_1, window_bounds = array<i64: 16, 128>}]} {
    %c0 = arith.constant 0 : index
    %c0_0 = arith.constant 0 : index
    %0 = vector.load %arg1[%c0, %c0_0] : memref<16x128xf32, #tpu.memory_space<vmem>>, vector<16x128xf32>
    %c0_1 = arith.constant 0 : index
    %c0_2 = arith.constant 0 : index
    %1 = vector.load %arg2[%c0_1, %c0_2] : memref<16x128xf32, #tpu.memory_space<vmem>>, vector<16x128xf32>
    tpu.vector_store %arg2[%c0_1, %c0_2], %0 {strides = array<i32>} : memref<16x128xf32, #tpu.memory_space<vmem>>, vector<16x128xf32>,
    return
  }
  func.func @transform_0(%arg0: i32) -> (i32, i32) {
    %c0_i32 = arith.constant 0 : i32
    %c0_i32_0 = arith.constant 0 : i32
    return %arg0, %c0_i32 : i32, i32
  }
  func.func @transform_1(%arg0: i32) -> (i32, i32) {
    %c0_i32 = arith.constant 0 : i32
    %c0_i32_0 = arith.constant 0 : i32
    return %arg0, %c0_i32 : i32, i32
  }
}

</mosaic_0001>

<bundles_post_ra>
// kernel: tpu_custom_call.1
= control target key start
LH: loop header
LB: loop body
LE: loop exit
PB: predicated region body
PF: predicated region fallthrough
CT: control target
= control target key end

     0   :  { %6 = vsyncpa [#allocation3], 0  ;;  %s134_s0 = inlined_call_operand.hbm [shape: f32[16,128], index: 0, kind: input, shape index: {}]   ;;  %s135_s1 = inlined_call_operand.hbm [shape: f32[16,128], index: 1, kind: output, shape index: {}]  }
   0x1   :  { %7 = vsyncpa [#allocation4], 0  ;;  %s96_s6 = smov [#allocation2]   ;;  %s48_s10 = scalar_lea.hbm %s134_s0, 256 }
   0x2   :  { %s13_s7 = sshll.u32 %s96_s6, 4  ;;  %p49_p0 = scmp.ne.s32.totalorder %s134_s0, %s48_s10  ;;  %s14_s7 = int_to_ptr.vmem [resolvable:$true] %s13_s7 }
   0x3   :  { %p52_p1 = scmp.lt.u32.totalorder %s48_s10, %s134_s0 }
   0x5   :  { %p54_p2 = pnand %p52_p1, %p49_p0 }
   0x7   :  { %57 = shalt.err (!%p54_p2)
}
   0x8   :  { %s58_s15 = scalar_lea.vmem %s14_s7, 256  ;;  %p63_p4 = scmp.lt.s32.totalorder %s14_s7, %s14_s7 }
   0x9   :  { %p59_p3 = scmp.ne.s32.totalorder %s14_s7, %s58_s15  ;;  %p64_p5 = scmp.lt.s32.totalorder %s58_s15, %s58_s15 }
   0xb   :  { %p65_p6 = por %p64_p5, %p63_p4 }
   0xd   :  { %p66_p7 = pnand %p65_p6, %p59_p3 }
   0xf   :  { %69 = shalt.err (!%p66_p7)
}
  0x10   :  { %s97_s16 = smov 128   ;;  %s98_s17 = smov 8  }
  0x11   :  { %19 = dma.hbm_to_vmem [thread:$0]  %s134_s0, 256, %s14_s7, [#allocation3], %s97_s16, %s97_s16, %s98_s17  }
  0x12   :  { %92 = dma.done.wait [#allocation3], 256  }
  0x13   :  { %93 = vsyncadd [#allocation3], 4294967040  ;;  %s99_s20 = smov [#allocation5]   ;;  %v23_v0 = vld [vmem:[#allocation2] sm:$0xff]  ;;  %v24_v1 = vld [vmem:[#allocation2 + $0x8] sm:$0xff] }
  0x14   :  { %s32_s21 = sshll.u32 %s99_s20, 4  ;;  %25 = vst [vmem:[#allocation5] sm:$0xff] %v23_v0  ;;  %26 = vst [vmem:[#allocation5 + $0x8] sm:$0xff] %v24_v1  ;;  %s33_s21 = int_to_ptr.vmem [resolvable:$true] %s32_s21 }
  0x15   :  { %s70_s22 = scalar_lea.vmem %s33_s21, 256  ;;  %p75_p9 = scmp.lt.s32.totalorder %s33_s21, %s33_s21 }
  0x16   :  { %p71_p8 = scmp.ne.s32.totalorder %s33_s21, %s70_s22  ;;  %p76_p10 = scmp.lt.s32.totalorder %s70_s22, %s70_s22 }
  0x18   :  { %p77_p11 = por %p76_p10, %p75_p9 }
  0x1a   :  { %p78_p12 = pnand %p77_p11, %p71_p8 }
  0x1c   :  { %81 = shalt.err (!%p78_p12)
}
  0x1d   :  { %s82_s0 = scalar_lea.hbm %s135_s1, 256 }
  0x1e   :  { %p83_p13 = scmp.ne.s32.totalorder %s135_s1, %s82_s0  ;;  %p86_p0 = scmp.lt.u32.totalorder %s82_s0, %s135_s1 }
  0x20   :  { %p88_p1 = pnand %p86_p0, %p83_p13 }
  0x22   :  { %91 = shalt.err (!%p88_p1)
}
  0x23   :  { %38 = dma.vmem_to_hbm [thread:$0]  %s33_s21, 256, %s135_s1, [#allocation4], %s97_s16, %s97_s16, %s98_s17  }
  0x24   :  { %94 = dma.done.wait [#allocation4], 256  }
  0x25   :  { %95 = vsyncadd [#allocation4], 4294967040 }
  0x26   :  { %42 = vsyncpa [#allocation3], 1 }
  0x27   :  { %43 = vsyncpa [#allocation4], 1 }

</bundles_post_ra>
